<compile_context>
chip_gen: v6e
topology: v6e:2x2x1
jax: 0.10.0
libtpu: 0.0.40
codegen_flags: <defaults>
</compile_context>

<pallas_src>
import jax
import jax.numpy as jnp
from jax import lax
from jax.experimental import pallas as pl
from jax.experimental.pallas import tpu as pltpu

SEQ = 8          # sequence length (small test shape)
HIDDEN = 32      # hidden_layer_size (4*H = 128 -> gates fill exactly one vreg lane dim)
IN_SIZE = 1      # input_size
OUT_SIZE = 1     # output_size


def lstm_kernel(x_ref, p_ref, out_ref):
    H = p_ref.shape[1] // 4          # 32
    seq = x_ref.shape[0]

    # Loop-invariant recurrent weight: loaded into vregs ONCE, reused each step.
    whh_t = p_ref[0:H, :]            # (H, 4H)
    wih   = p_ref[H:H + 1, :]        # (1, 4H)
    bias  = p_ref[H + 1:H + 2, :]    # (1, 4H)
    wlin  = p_ref[H + 2:H + 3, 0:H]  # (1, H)
    blin  = p_ref[H + 3:H + 4, 0:1]  # (1, 1)

    # Input projection without the MXU (input_size == 1):
    # (seq, 1) * (1, 4H) + (1, 4H) -> (seq, 4H). One-time, off the recurrence path.
    gx = x_ref[...] * wih + bias

    # ---- step 0: h == c == 0, so skip the recurrent matmul and f*c ----------
    s = jax.nn.sigmoid(gx[0:1, :])               # single EUP pass over 128 lanes
    i = s[:, 0:H]
    g = 2.0 * s[:, 2 * H:3 * H] - 1.0            # tanh via pre-scaled sigmoid (VPU fma)
    o = s[:, 3 * H:4 * H]
    c = i * g                                    # (1, H), lanes 0:H
    h = o * jnp.tanh(c)                          # (1, H), lanes 0:H

    # ---- steps 1..seq-1: state carried in vregs, fully static unroll --------
    for t in range(1, seq):
        gates = gx[t:t + 1, :] + jnp.dot(
            h, whh_t, preferred_element_type=jnp.float32)     # (1, 4H)
        s = jax.nn.sigmoid(gates)                # the ONLY gate transcendental
        i = s[:, 0:H]                            # roll-free (already at lanes 0:H)
        f = s[:, H:2 * H]                        # one lane roll (parallel with g's)
        g = 2.0 * s[:, 2 * H:3 * H] - 1.0        # tanh(pre-act) == 2*sigmoid(2*pre-act)-1
        o = s[:, 3 * H:4 * H]                    # roll hides under tanh(c) below
        c = f * c + i * g
        h = o * jnp.tanh(c)

    # Final Linear (output_size == 1): VPU multiply + lane reduce, no MXU tail.
    y = jnp.sum(h * wlin, axis=1, keepdims=True) + blin       # (1, 1)
    out_ref[...] = y


def prepare_params(w_ih, w_hh, b_ih, b_hh, w_lin, b_lin):
    """One-time parameter prep: transpose, bias-combine, g-gate pre-scale, slab pack."""
    H = w_hh.shape[1]
    G = 4 * H
    # tanh(x) == 2*sigmoid(2x) - 1  ->  pre-scale g-gate pre-activation by 2.
    gscale = jnp.ones((G,), jnp.float32).at[2 * H:3 * H].set(2.0)

    wih_row = (w_ih[:, 0].astype(jnp.float32) * gscale)                 # (4H,)
    bias = ((b_ih + b_hh).astype(jnp.float32) * gscale)                 # (4H,)
    whh_t = (w_hh.T.astype(jnp.float32) * gscale[None, :])              # (H, 4H)

    rows = ((H + 4 + 7) // 8) * 8                                       # 40 (sublane multiple of 8)
    slab = jnp.zeros((rows, G), jnp.float32)
    slab = slab.at[0:H, :].set(whh_t)
    slab = slab.at[H, :].set(wih_row)
    slab = slab.at[H + 1, :].set(bias)
    slab = slab.at[H + 2, 0:H].set(w_lin[0].astype(jnp.float32))
    slab = slab.at[H + 3, 0].set(b_lin[0].astype(jnp.float32))
    return slab


@jax.jit
def lstm_model_forward(input_seq, params_slab):
    """Pallas equivalent of LSTMModel.forward. input_seq: (SEQ,) f32."""
    x = input_seq.reshape(-1, IN_SIZE).astype(jnp.float32)              # (SEQ, 1)

    out = pl.pallas_call(
        lstm_kernel,
        out_shape=jax.ShapeDtypeStruct((1, 1), jnp.float32),
        in_specs=[pl.BlockSpec(memory_space=pltpu.MemorySpace.VMEM)] * 2,
        out_specs=pl.BlockSpec(memory_space=pltpu.MemorySpace.VMEM),
    )(x, params_slab)

    # predictions[-1] -> shape (output_size,)
    return out[0]


def reference_forward(input_seq, w_ih, w_hh, b_ih, b_hh, w_lin, b_lin):
    """Pure-JAX reference matching torch.nn.LSTM + Linear semantics."""
    H = w_hh.shape[1]
    x = input_seq.reshape(-1, IN_SIZE).astype(jnp.float32)

    def step(carry, xt):
        h, c = carry
        gates = xt @ w_ih.T + b_ih + h @ w_hh.T + b_hh
        i = jax.nn.sigmoid(gates[0:H])
        f = jax.nn.sigmoid(gates[H:2 * H])
        g = jnp.tanh(gates[2 * H:3 * H])
        o = jax.nn.sigmoid(gates[3 * H:4 * H])
        c = f * c + i * g
        h = o * jnp.tanh(c)
        return (h, c), h

    (_, _), hs = lax.scan(step, (jnp.zeros(H), jnp.zeros(H)), x)
    return hs[-1] @ w_lin.T + b_lin


if __name__ == "__main__":
    key = jax.random.PRNGKey(0)
    ks = jax.random.split(key, 7)
    H = HIDDEN
    bound = 1.0 / (H ** 0.5)  # PyTorch uniform(-1/sqrt(H), 1/sqrt(H)) init

    w_ih = jax.random.uniform(ks[0], (4 * H, IN_SIZE), jnp.float32, -bound, bound)
    w_hh = jax.random.uniform(ks[1], (4 * H, H), jnp.float32, -bound, bound)
    b_ih = jax.random.uniform(ks[2], (4 * H,), jnp.float32, -bound, bound)
    b_hh = jax.random.uniform(ks[3], (4 * H,), jnp.float32, -bound, bound)
    w_lin = jax.random.uniform(ks[4], (OUT_SIZE, H), jnp.float32, -bound, bound)
    b_lin = jax.random.uniform(ks[5], (OUT_SIZE,), jnp.float32, -bound, bound)

    input_seq = jax.random.normal(ks[6], (SEQ,), jnp.float32)

    params_slab = prepare_params(w_ih, w_hh, b_ih, b_hh, w_lin, b_lin)
    pred = lstm_model_forward(input_seq, params_slab)
    pred = jax.block_until_ready(pred)

    ref = reference_forward(input_seq, w_ih, w_hh, b_ih, b_hh, w_lin, b_lin)
    assert pred.shape == (OUT_SIZE,)
    assert jnp.allclose(pred, ref, atol=1e-5, rtol=1e-5), (pred, ref)

    print("KERNEL_OK")
</pallas_src>

<mosaic_0001>
module attributes {stable_mosaic.version = 11 : i64} {
  func.func @lstm_kernel(%arg0: memref<8x1xf32, #tpu.memory_space<vmem>>, %arg1: memref<40x128xf32, #tpu.memory_space<vmem>>, %arg2: memref<1x1xf32, #tpu.memory_space<vmem>>) attributes {dimension_semantics = [], scalar_prefetch = 0 : i64, scratch_operands = 0 : i64, tpu.core_type = #tpu.core_type<tc>} {
    %c0 = arith.constant 0 : index
    %c0_0 = arith.constant 0 : index
    %0 = vector.load %arg1[%c0, %c0_0] : memref<40x128xf32, #tpu.memory_space<vmem>>, vector<32x128xf32>
    %c32 = arith.constant 32 : index
    %c0_1 = arith.constant 0 : index
    %1 = vector.load %arg1[%c32, %c0_1] : memref<40x128xf32, #tpu.memory_space<vmem>>, vector<1x128xf32>
    %c33 = arith.constant 33 : index
    %c0_2 = arith.constant 0 : index
    %2 = vector.load %arg1[%c33, %c0_2] : memref<40x128xf32, #tpu.memory_space<vmem>>, vector<1x128xf32>
    %c34 = arith.constant 34 : index
    %c0_3 = arith.constant 0 : index
    %3 = vector.load %arg1[%c34, %c0_3] : memref<40x128xf32, #tpu.memory_space<vmem>>, vector<1x32xf32>
    %c35 = arith.constant 35 : index
    %c0_4 = arith.constant 0 : index
    %4 = vector.load %arg1[%c35, %c0_4] : memref<40x128xf32, #tpu.memory_space<vmem>>, vector<1x1xf32>
    %c0_5 = arith.constant 0 : index
    %c0_6 = arith.constant 0 : index
    %5 = vector.load %arg0[%c0_5, %c0_6] : memref<8x1xf32, #tpu.memory_space<vmem>>, vector<8x1xf32>
    %6 = vector.broadcast %5 : vector<8x1xf32> to vector<8x128xf32>
    %7 = vector.broadcast %1 : vector<1x128xf32> to vector<8x128xf32>
    %8 = arith.mulf %6, %7 : vector<8x128xf32>
    %9 = vector.broadcast %2 : vector<1x128xf32> to vector<8x128xf32>
    %10 = arith.addf %8, %9 : vector<8x128xf32>
    %11 = vector.extract_strided_slice %10 {offsets = [0, 0], sizes = [1, 128], strides = [1, 1]} : vector<8x128xf32> to vector<1x128xf32>
    %12 = arith.negf %11 : vector<1x128xf32>
    %13 = math.exp %12 : vector<1x128xf32>
    %cst = arith.constant 1.000000e+00 : f32
    %14 = vector.broadcast %cst : f32 to vector<1x128xf32>
    %15 = arith.addf %14, %13 : vector<1x128xf32>
    %16 = arith.divf %14, %15 : vector<1x128xf32>
    %17 = vector.extract_strided_slice %16 {offsets = [0, 0], sizes = [1, 32], strides = [1, 1]} : vector<1x128xf32> to vector<1x32xf32>
    %18 = vector.extract_strided_slice %16 {offsets = [0, 64], sizes = [1, 32], strides = [1, 1]} : vector<1x128xf32> to vector<1x32xf32>
    %cst_7 = arith.constant 2.000000e+00 : f32
    %19 = vector.broadcast %cst_7 : f32 to vector<1x32xf32>
    %20 = arith.mulf %19, %18 : vector<1x32xf32>
    %cst_8 = arith.constant 1.000000e+00 : f32
    %21 = vector.broadcast %cst_8 : f32 to vector<1x32xf32>
    %22 = arith.subf %20, %21 : vector<1x32xf32>
    %23 = vector.extract_strided_slice %16 {offsets = [0, 96], sizes = [1, 32], strides = [1, 1]} : vector<1x128xf32> to vector<1x32xf32>
    %24 = arith.mulf %17, %22 : vector<1x32xf32>
    %25 = math.tanh %24 : vector<1x32xf32>
    %26 = arith.mulf %23, %25 : vector<1x32xf32>
    %27 = vector.extract_strided_slice %10 {offsets = [1, 0], sizes = [1, 128], strides = [1, 1]} : vector<8x128xf32> to vector<1x128xf32>
    %cst_9 = arith.constant dense<0.000000e+00> : vector<1x128xf32>
    %28 = tpu.matmul %26, %0, %cst_9 {dimension_numbers = #tpu.dot_dimension_numbers<[1], [0], [0], [1], [0, 0, 1, 1], [], []>} : vector<1x32xf32>, vector<32x128xf32>, vector<1x128xf32> -> vector<1x128xf32>
    %29 = arith.addf %27, %28 : vector<1x128xf32>
    %30 = arith.negf %29 : vector<1x128xf32>
    %31 = math.exp %30 : vector<1x128xf32>
    %cst_10 = arith.constant 1.000000e+00 : f32
    %32 = vector.broadcast %cst_10 : f32 to vector<1x128xf32>
    %33 = arith.addf %32, %31 : vector<1x128xf32>
    %34 = arith.divf %32, %33 : vector<1x128xf32>
    %35 = vector.extract_strided_slice %34 {offsets = [0, 0], sizes = [1, 32], strides = [1, 1]} : vector<1x128xf32> to vector<1x32xf32>
    %36 = vector.extract_strided_slice %34 {offsets = [0, 32], sizes = [1, 32], strides = [1, 1]} : vector<1x128xf32> to vector<1x32xf32>
    %37 = vector.extract_strided_slice %34 {offsets = [0, 64], sizes = [1, 32], strides = [1, 1]} : vector<1x128xf32> to vector<1x32xf32>
    %cst_11 = arith.constant 2.000000e+00 : f32
    %38 = vector.broadcast %cst_11 : f32 to vector<1x32xf32>
    %39 = arith.mulf %38, %37 : vector<1x32xf32>
    %cst_12 = arith.constant 1.000000e+00 : f32
    %40 = vector.broadcast %cst_12 : f32 to vector<1x32xf32>
    %41 = arith.subf %39, %40 : vector<1x32xf32>
    %42 = vector.extract_strided_slice %34 {offsets = [0, 96], sizes = [1, 32], strides = [1, 1]} : vector<1x128xf32> to vector<1x32xf32>
    %43 = arith.mulf %36, %24 : vector<1x32xf32>
    %44 = arith.mulf %35, %41 : vector<1x32xf32>
    %45 = arith.addf %43, %44 : vector<1x32xf32>
    %46 = math.tanh %45 : vector<1x32xf32>
    %47 = arith.mulf %42, %46 : vector<1x32xf32>
    %48 = vector.extract_strided_slice %10 {offsets = [2, 0], sizes = [1, 128], strides = [1, 1]} : vector<8x128xf32> to vector<1x128xf32>
    %cst_13 = arith.constant dense<0.000000e+00> : vector<1x128xf32>
    %49 = tpu.matmul %47, %0, %cst_13 {dimension_numbers = #tpu.dot_dimension_numbers<[1], [0], [0], [1], [0, 0, 1, 1], [], []>} : vector<1x32xf32>, vector<32x128xf32>, vector<1x128xf32> -> vector<1x128xf32>
    %50 = arith.addf %48, %49 : vector<1x128xf32>
    %51 = arith.negf %50 : vector<1x128xf32>
    %52 = math.exp %51 : vector<1x128xf32>
    %cst_14 = arith.constant 1.000000e+00 : f32
    %53 = vector.broadcast %cst_14 : f32 to vector<1x128xf32>
    %54 = arith.addf %53, %52 : vector<1x128xf32>
    %55 = arith.divf %53, %54 : vector<1x128xf32>
    %56 = vector.extract_strided_slice %55 {offsets = [0, 0], sizes = [1, 32], strides = [1, 1]} : vector<1x128xf32> to vector<1x32xf32>
    %57 = vector.extract_strided_slice %55 {offsets = [0, 32], sizes = [1, 32], strides = [1, 1]} : vector<1x128xf32> to vector<1x32xf32>
    %58 = vector.extract_strided_slice %55 {offsets = [0, 64], sizes = [1, 32], strides = [1, 1]} : vector<1x128xf32> to vector<1x32xf32>
    %cst_15 = arith.constant 2.000000e+00 : f32
    %59 = vector.broadcast %cst_15 : f32 to vector<1x32xf32>
    %60 = arith.mulf %59, %58 : vector<1x32xf32>
    %cst_16 = arith.constant 1.000000e+00 : f32
    %61 = vector.broadcast %cst_16 : f32 to vector<1x32xf32>
    %62 = arith.subf %60, %61 : vector<1x32xf32>
    %63 = vector.extract_strided_slice %55 {offsets = [0, 96], sizes = [1, 32], strides = [1, 1]} : vector<1x128xf32> to vector<1x32xf32>
    %64 = arith.mulf %57, %45 : vector<1x32xf32>
    %65 = arith.mulf %56, %62 : vector<1x32xf32>
    %66 = arith.addf %64, %65 : vector<1x32xf32>
    %67 = math.tanh %66 : vector<1x32xf32>
    %68 = arith.mulf %63, %67 : vector<1x32xf32>
    %69 = vector.extract_strided_slice %10 {offsets = [3, 0], sizes = [1, 128], strides = [1, 1]} : vector<8x128xf32> to vector<1x128xf32>
    %cst_17 = arith.constant dense<0.000000e+00> : vector<1x128xf32>
    %70 = tpu.matmul %68, %0, %cst_17 {dimension_numbers = #tpu.dot_dimension_numbers<[1], [0], [0], [1], [0, 0, 1, 1], [], []>} : vector<1x32xf32>, vector<32x128xf32>, vector<1x128xf32> -> vector<1x128xf32>
    %71 = arith.addf %69, %70 : vector<1x128xf32>
    %72 = arith.negf %71 : vector<1x128xf32>
    %73 = math.exp %72 : vector<1x128xf32>
    %cst_18 = arith.constant 1.000000e+00 : f32
    %74 = vector.broadcast %cst_18 : f32 to vector<1x128xf32>
    %75 = arith.addf %74, %73 : vector<1x128xf32>
    %76 = arith.divf %74, %75 : vector<1x128xf32>
    %77 = vector.extract_strided_slice %76 {offsets = [0, 0], sizes = [1, 32], strides = [1, 1]} : vector<1x128xf32> to vector<1x32xf32>
    %78 = vector.extract_strided_slice %76 {offsets = [0, 32], sizes = [1, 32], strides = [1, 1]} : vector<1x128xf32> to vector<1x32xf32>
    %79 = vector.extract_strided_slice %76 {offsets = [0, 64], sizes = [1, 32], strides = [1, 1]} : vector<1x128xf32> to vector<1x32xf32>
    %cst_19 = arith.constant 2.000000e+00 : f32
    %80 = vector.broadcast %cst_19 : f32 to vector<1x32xf32>
    %81 = arith.mulf %80, %79 : vector<1x32xf32>
    %cst_20 = arith.constant 1.000000e+00 : f32
    %82 = vector.broadcast %cst_20 : f32 to vector<1x32xf32>
    %83 = arith.subf %81, %82 : vector<1x32xf32>
    %84 = vector.extract_strided_slice %76 {offsets = [0, 96], sizes = [1, 32], strides = [1, 1]} : vector<1x128xf32> to vector<1x32xf32>
    %85 = arith.mulf %78, %66 : vector<1x32xf32>
    %86 = arith.mulf %77, %83 : vector<1x32xf32>
    %87 = arith.addf %85, %86 : vector<1x32xf32>
    %88 = math.tanh %87 : vector<1x32xf32>
    %89 = arith.mulf %84, %88 : vector<1x32xf32>
    %90 = vector.extract_strided_slice %10 {offsets = [4, 0], sizes = [1, 128], strides = [1, 1]} : vector<8x128xf32> to vector<1x128xf32>
    %cst_21 = arith.constant dense<0.000000e+00> : vector<1x128xf32>
    %91 = tpu.matmul %89, %0, %cst_21 {dimension_numbers = #tpu.dot_dimension_numbers<[1], [0], [0], [1], [0, 0, 1, 1], [], []>} : vector<1x32xf32>, vector<32x128xf32>, vector<1x128xf32> -> vector<1x128xf32>
    %92 = arith.addf %90, %91 : vector<1x128xf32>
    %93 = arith.negf %92 : vector<1x128xf32>
    %94 = math.exp %93 : vector<1x128xf32>
    %cst_22 = arith.constant 1.000000e+00 : f32
    %95 = vector.broadcast %cst_22 : f32 to vector<1x128xf32>
    %96 = arith.addf %95, %94 : vector<1x128xf32>
    %97 = arith.divf %95, %96 : vector<1x128xf32>
    %98 = vector.extract_strided_slice %97 {offsets = [0, 0], sizes = [1, 32], strides = [1, 1]} : vector<1x128xf32> to vector<1x32xf32>
    %99 = vector.extract_strided_slice %97 {offsets = [0, 32], sizes = [1, 32], strides = [1, 1]} : vector<1x128xf32> to vector<1x32xf32>
    %100 = vector.extract_strided_slice %97 {offsets = [0, 64], sizes = [1, 32], strides = [1, 1]} : vector<1x128xf32> to vector<1x32xf32>
    %cst_23 = arith.constant 2.000000e+00 : f32
    %101 = vector.broadcast %cst_23 : f32 to vector<1x32xf32>
    %102 = arith.mulf %101, %100 : vector<1x32xf32>
    %cst_24 = arith.constant 1.000000e+00 : f32
    %103 = vector.broadcast %cst_24 : f32 to vector<1x32xf32>
    %104 = arith.subf %102, %103 : vector<1x32xf32>
    %105 = vector.extract_strided_slice %97 {offsets = [0, 96], sizes = [1, 32], strides = [1, 1]} : vector<1x128xf32> to vector<1x32xf32>
    %106 = arith.mulf %99, %87 : vector<1x32xf32>
    %107 = arith.mulf %98, %104 : vector<1x32xf32>
    %108 = arith.addf %106, %107 : vector<1x32xf32>
    %109 = math.tanh %108 : vector<1x32xf32>
    %110 = arith.mulf %105, %109 : vector<1x32xf32>
    %111 = vector.extract_strided_slice %10 {offsets = [5, 0], sizes = [1, 128], strides = [1, 1]} : vector<8x128xf32> to vector<1x128xf32>
    %cst_25 = arith.constant dense<0.000000e+00> : vector<1x128xf32>
    %112 = tpu.matmul %110, %0, %cst_25 {dimension_numbers = #tpu.dot_dimension_numbers<[1], [0], [0], [1], [0, 0, 1, 1], [], []>} : vector<1x32xf32>, vector<32x128xf32>, vector<1x128xf32> -> vector<1x128xf32>
    %113 = arith.addf %111, %112 : vector<1x128xf32>
    %114 = arith.negf %113 : vector<1x128xf32>
    %115 = math.exp %114 : vector<1x128xf32>
    %cst_26 = arith.constant 1.000000e+00 : f32
    %116 = vector.broadcast %cst_26 : f32 to vector<1x128xf32>
    %117 = arith.addf %116, %115 : vector<1x128xf32>
    %118 = arith.divf %116, %117 : vector<1x128xf32>
    %119 = vector.extract_strided_slice %118 {offsets = [0, 0], sizes = [1, 32], strides = [1, 1]} : vector<1x128xf32> to vector<1x32xf32>
    %120 = vector.extract_strided_slice %118 {offsets = [0, 32], sizes = [1, 32], strides = [1, 1]} : vector<1x128xf32> to vector<1x32xf32>
    %121 = vector.extract_strided_slice %118 {offsets = [0, 64], sizes = [1, 32], strides = [1, 1]} : vector<1x128xf32> to vector<1x32xf32>
    %cst_27 = arith.constant 2.000000e+00 : f32
    %122 = vector.broadcast %cst_27 : f32 to vector<1x32xf32>
    %123 = arith.mulf %122, %121 : vector<1x32xf32>
    %cst_28 = arith.constant 1.000000e+00 : f32
    %124 = vector.broadcast %cst_28 : f32 to vector<1x32xf32>
    %125 = arith.subf %123, %124 : vector<1x32xf32>
    %126 = vector.extract_strided_slice %118 {offsets = [0, 96], sizes = [1, 32], strides = [1, 1]} : vector<1x128xf32> to vector<1x32xf32>
    %127 = arith.mulf %120, %108 : vector<1x32xf32>
    %128 = arith.mulf %119, %125 : vector<1x32xf32>
    %129 = arith.addf %127, %128 : vector<1x32xf32>
    %130 = math.tanh %129 : vector<1x32xf32>
    %131 = arith.mulf %126, %130 : vector<1x32xf32>
    %132 = vector.extract_strided_slice %10 {offsets = [6, 0], sizes = [1, 128], strides = [1, 1]} : vector<8x128xf32> to vector<1x128xf32>
    %cst_29 = arith.constant dense<0.000000e+00> : vector<1x128xf32>
    %133 = tpu.matmul %131, %0, %cst_29 {dimension_numbers = #tpu.dot_dimension_numbers<[1], [0], [0], [1], [0, 0, 1, 1], [], []>} : vector<1x32xf32>, vector<32x128xf32>, vector<1x128xf32> -> vector<1x128xf32>
    %134 = arith.addf %132, %133 : vector<1x128xf32>
    %135 = arith.negf %134 : vector<1x128xf32>
    %136 = math.exp %135 : vector<1x128xf32>
    %cst_30 = arith.constant 1.000000e+00 : f32
    %137 = vector.broadcast %cst_30 : f32 to vector<1x128xf32>
    %138 = arith.addf %137, %136 : vector<1x128xf32>
    %139 = arith.divf %137, %138 : vector<1x128xf32>
    %140 = vector.extract_strided_slice %139 {offsets = [0, 0], sizes = [1, 32], strides = [1, 1]} : vector<1x128xf32> to vector<1x32xf32>
    %141 = vector.extract_strided_slice %139 {offsets = [0, 32], sizes = [1, 32], strides = [1, 1]} : vector<1x128xf32> to vector<1x32xf32>
    %142 = vector.extract_strided_slice %139 {offsets = [0, 64], sizes = [1, 32], strides = [1, 1]} : vector<1x128xf32> to vector<1x32xf32>
    %cst_31 = arith.constant 2.000000e+00 : f32
    %143 = vector.broadcast %cst_31 : f32 to vector<1x32xf32>
    %144 = arith.mulf %143, %142 : vector<1x32xf32>
    %cst_32 = arith.constant 1.000000e+00 : f32
    %145 = vector.broadcast %cst_32 : f32 to vector<1x32xf32>
    %146 = arith.subf %144, %145 : vector<1x32xf32>
    %147 = vector.extract_strided_slice %139 {offsets = [0, 96], sizes = [1, 32], strides = [1, 1]} : vector<1x128xf32> to vector<1x32xf32>
    %148 = arith.mulf %141, %129 : vector<1x32xf32>
    %149 = arith.mulf %140, %146 : vector<1x32xf32>
    %150 = arith.addf %148, %149 : vector<1x32xf32>
    %151 = math.tanh %150 : vector<1x32xf32>
    %152 = arith.mulf %147, %151 : vector<1x32xf32>
    %153 = vector.extract_strided_slice %10 {offsets = [7, 0], sizes = [1, 128], strides = [1, 1]} : vector<8x128xf32> to vector<1x128xf32>
    %cst_33 = arith.constant dense<0.000000e+00> : vector<1x128xf32>
    %154 = tpu.matmul %152, %0, %cst_33 {dimension_numbers = #tpu.dot_dimension_numbers<[1], [0], [0], [1], [0, 0, 1, 1], [], []>} : vector<1x32xf32>, vector<32x128xf32>, vector<1x128xf32> -> vector<1x128xf32>
    %155 = arith.addf %153, %154 : vector<1x128xf32>
    %156 = arith.negf %155 : vector<1x128xf32>
    %157 = math.exp %156 : vector<1x128xf32>
    %cst_34 = arith.constant 1.000000e+00 : f32
    %158 = vector.broadcast %cst_34 : f32 to vector<1x128xf32>
    %159 = arith.addf %158, %157 : vector<1x128xf32>
    %160 = arith.divf %158, %159 : vector<1x128xf32>
    %161 = vector.extract_strided_slice %160 {offsets = [0, 0], sizes = [1, 32], strides = [1, 1]} : vector<1x128xf32> to vector<1x32xf32>
    %162 = vector.extract_strided_slice %160 {offsets = [0, 32], sizes = [1, 32], strides = [1, 1]} : vector<1x128xf32> to vector<1x32xf32>
    %163 = vector.extract_strided_slice %160 {offsets = [0, 64], sizes = [1, 32], strides = [1, 1]} : vector<1x128xf32> to vector<1x32xf32>
    %cst_35 = arith.constant 2.000000e+00 : f32
    %164 = vector.broadcast %cst_35 : f32 to vector<1x32xf32>
    %165 = arith.mulf %164, %163 : vector<1x32xf32>
    %cst_36 = arith.constant 1.000000e+00 : f32
    %166 = vector.broadcast %cst_36 : f32 to vector<1x32xf32>
    %167 = arith.subf %165, %166 : vector<1x32xf32>
    %168 = vector.extract_strided_slice %160 {offsets = [0, 96], sizes = [1, 32], strides = [1, 1]} : vector<1x128xf32> to vector<1x32xf32>
    %169 = arith.mulf %162, %150 : vector<1x32xf32>
    %170 = arith.mulf %161, %167 : vector<1x32xf32>
    %171 = arith.addf %169, %170 : vector<1x32xf32>
    %172 = math.tanh %171 : vector<1x32xf32>
    %173 = arith.mulf %168, %172 : vector<1x32xf32>
    %174 = arith.mulf %173, %3 : vector<1x32xf32>
    %cst_37 = arith.constant dense<0.000000e+00> : vector<1xf32>
    %175 = vector.multi_reduction <add>, %174, %cst_37 [1] : vector<1x32xf32> to vector<1xf32>
    %176 = vector.shape_cast %175 : vector<1xf32> to vector<1x1xf32>
    %177 = arith.addf %176, %4 : vector<1x1xf32>
    %c0_38 = arith.constant 0 : index
    %c0_39 = arith.constant 0 : index
    %178 = vector.load %arg2[%c0_38, %c0_39] : memref<1x1xf32, #tpu.memory_space<vmem>>, vector<1x1xf32>
    tpu.vector_store %arg2[%c0_38, %c0_39], %177 {strides = array<i32>} : memref<1x1xf32, #tpu.memory_space<vmem>>, vector<1x1xf32>,
    return
  }
}

</mosaic_0001>

<bundles_post_ra>
// kernel: lstm_model_forward.1
= control target key start
LH: loop header
LB: loop body
LE: loop exit
PB: predicated region body
PF: predicated region fallthrough
CT: control target
= control target key end

     0   :  { %7 = vsyncpa [#allocation3], 0  ;;  %s1264_s0 = inlined_call_operand.vmem [shape: f32[8,1], index: 0, kind: input, shape index: {}]   ;;  %s1265_s1 = inlined_call_operand.hbm [shape: f32[40,128], index: 1, kind: input, shape index: {}]   ;;  %s1266_s2 = inlined_call_operand.hbm [shape: f32[1,1], index: 2, kind: output, shape index: {}]  }
   0x1   :  { %8 = vsyncpa [#allocation4], 0  ;;  %s1102_s9 = smov [#allocation2]  }
   0x2   :  { %s16_s10 = sshll.u32 %s1102_s9, 4  ;;  %s17_s10 = int_to_ptr.vmem [resolvable:$true] %s16_s10 }
   0x3   :  { %s1066_s11 = scalar_lea.vmem %s17_s10, 640  ;;  %p1071_p1 = scmp.lt.s32.totalorder %s17_s10, %s17_s10 }
   0x4   :  { %p1067_p0 = scmp.ne.s32.totalorder %s17_s10, %s1066_s11  ;;  %p1072_p2 = scmp.lt.s32.totalorder %s1066_s11, %s1066_s11 }
   0x6   :  { %p1073_p3 = por %p1072_p2, %p1071_p1 }
   0x8   :  { %p1074_p4 = pnand %p1073_p3, %p1067_p0 }
   0xa   :  { %1077 = shalt.err (!%p1074_p4)
}
   0xb   :  { %s1103_s12 = smov 128   ;;  %s1104_s13 = smov 8  }
   0xc   :  { %22 = dma.hbm_to_vmem [thread:$0]  %s1265_s1, 640, %s17_s10, [#allocation3], %s1103_s12, %s1103_s12, %s1104_s13  }
   0xd   :  { %1098 = dma.done.wait [#allocation3], 640  }
   0xe   :  { %1099 = vsyncadd [#allocation3], 4294966656  ;;  %v1105_v0 = vmov 0   ;;  %v34_v1 = vld [vmem:[%s1264_s0] sm:$0xff]  ;;  %s1106_s1 = smov 64   ;;  %v1137_v15 = vld [vmem:[#allocation2 + $0x18] sm:$0xff] }
   0xf   :  { %1009 = vset.pattern.permute.xlu0 %v1105_v0  ;;  %v862_v2 = vld [vmem:[#allocation2 + $0x20] ss:$0 sm:$0xff]  ;;  %v863_v4 = vld [vmem:[#allocation2 + $0x21] ss:$0 sm:$0xff]  ;;  %v1107_v16 = vmov 0.0   ;;  %v1140_v17 = vld [vmem:[#allocation2 + $0x10] sm:$0xff] }
  0x10   :  { %37 = vperm.xlu0 %1009, %v34_v1   ;;  %922 = vmatprep.subr.mxu0 %v1107_v16  ;;  %vm1108_vm0 = vmmov 0   ;;  %v1147_v18 = vld [vmem:[#allocation2 + $0x8] sm:$0xff]  ;;  %s1109_s0 = smov 96   ;;  %v1162_v20 = vld [vmem:[#allocation2] sm:$0xff]  ;;  %s1110_s18 = smov 32   ;;  %vm72_vm1 = vcmask 261120  }
  0x11   :  { %930 = vmatprep.mubr.msk.f32.mxu0 %vm1108_vm0, %v1107_v16  ;;  %923 = vmatpush3.msra.mxu0 %v1137_v15  ;;  %vm837_vm2 = vcmask 261127   ;;  %s1111_s19 = smov [#allocation5]   ;;  %vm845_vm3 = vcmask 7175  }
  0x12   :  { %933 = vmatprep.subr.mxu1 %v1107_v16  ;;  %924 = vmatprep.subr.mxu0 %v1107_v16  ;;  %s853_s20 = sshll.u32 %s1111_s19, 4  ;;  %s854_s20 = int_to_ptr.vmem [resolvable:$true] %s853_s20 }
  0x13   :  { %934 = vmatpush3.msra.mxu1 %v1137_v15  ;;  %925 = vmatpush3.msra.mxu0 %v1140_v17  ;;  %s1078_s21 = scalar_lea.vmem %s854_s20, 16  ;;  %s1082_s22 = scalar_lea.vmem %s854_s20, 32 }
  0x14   :  { %935 = vmatprep.subr.mxu1 %v1107_v16  ;;  %926 = vmatprep.subr.mxu0 %v1107_v16  ;;  %p1079_p5 = scmp.ne.s32.totalorder %s854_s20, %s1078_s21  ;;  %p1083_p6 = scmp.lt.s32.totalorder %s854_s20, %s854_s20 }
  0x15   :  { %936 = vmatpush3.msra.mxu1 %v1140_v17  ;;  %927 = vmatpush3.msra.mxu0 %v1147_v18  ;;  %p1084_p7 = scmp.lt.s32.totalorder %s1082_s22, %s1078_s21 }
  0x16   :  { %937 = vmatprep.subr.mxu1 %v1107_v16  ;;  %928 = vmatprep.subr.mxu0 %v1107_v16 }
  0x17   :  { %938 = vmatpush3.msra.mxu1 %v1147_v18  ;;  %941 = vmatprep.mubr.msk.f32.mxu1 %vm1108_vm0, %v1107_v16  ;;  %p1085_p8 = por %p1084_p7, %p1083_p6 }
  0x18   :  { %939 = vmatprep.subr.mxu1 %v1107_v16  ;;  %929 = vmatpush3.msra.mxu0 %v1162_v20 }
  0x19   :  { %940 = vmatpush3.msra.mxu1 %v1162_v20  ;;  %944 = vmatprep.subr.mxu0 %v1107_v16  ;;  %p1086_p9 = pnand %p1085_p8, %p1079_p5 }
  0x1a   :  { %955 = vmatprep.subr.mxu1 %v1107_v16 }
  0x8b   :  { %v38_v3 = vpop.permute.xlu0 %37 }
  0x8c   :  { %v44_v5 = vmul.f32 %v862_v2, %v38_v3 }
  0x8e   :  { %v1133_v6 = vadd.f32 %v863_v4, %v44_v5 }
  0x90   :  { %v864_v7 = vmul.f32 -1.442695, %v1133_v6 }
  0x92   :  { %1010 = vpow2.f32 %v864_v7 }
  0x9f   :  { %v1011_v8 = vpop.eup %1010 }
  0xa0   :  { %v53_v9 = vadd.f32 1.0, %v1011_v8 }
  0xa2   :  { %1012 = vrcp.f32 %v53_v9 }
  0xaf   :  { %v1013_v10 = vpop.eup %1012 }
  0xb0   :  { %v56_v11 = vmul.f32 2.0, %v1013_v10 }
  0xb2   :  { %v865_v12 = vadd.f32 -1.0, %v56_v11 }
  0xb4   :  { %59 = vrot.lane.b32.xlu0 %v865_v12, %s1106_s1 }
 0x126   :  { %v60_v13 = vpop.permute.xlu0 %59 }
 0x127   :  { %v62_v14 = vmul.f32 %v1013_v10, %v60_v13 }
 0x129   :  { %1014 = vtanh.f32 %v62_v14  ;;  %v158_v23 = vrot.slane %v62_v14, 7 }
 0x136   :  { %v1015_v19 = vpop.eup %1014 }
 0x137   :  { %65 = vrot.lane.b32.xlu1 %v1015_v19, %s1109_s0 }
 0x1a9   :  { %v66_v21 = vpop.permute.xlu1 %65 }
 0x1aa   :  { %v68_v22 = vmul.f32 %v1013_v10, %v66_v21 }
 0x1ac   :  { %70 = vrot.lane.b32.xlu1 %v68_v22, %s1110_s18 }
 0x1b0   :  { %159 = vrot.lane.b32.xlu1 %v158_v23, %s1110_s18 }
 0x21e   :  { %v71_v24 = vpop.permute.xlu1 %70 }
 0x21f   :  { %931 = vmatmul.mubr.msk.f32.vlgmr.msra.gmra.mxu0 %vm72_vm1, %v71_v24 }
 0x220   :  { %945 = vmatpush3.msra.mxu0 %v1137_v15  ;;  %952 = vmatprep.mubr.msk.f32.mxu0 %vm1108_vm0, %v1107_v16 }
 0x221   :  { %946 = vmatprep.subr.mxu0 %v1107_v16 }
 0x222   :  { %947 = vmatpush3.msra.mxu0 %v1140_v17  ;;  %v160_v37 = vpop.permute.xlu1 %159 }
 0x223   :  { %948 = vmatprep.subr.mxu0 %v1107_v16 }
 0x224   :  { %949 = vmatpush3.msra.mxu0 %v1147_v18 }
 0x225   :  { %950 = vmatprep.subr.mxu0 %v1107_v16 }
 0x226   :  { %951 = vmatpush3.msra.mxu0 %v1162_v20 }
 0x227   :  { %966 = vmatprep.subr.mxu0 %v1107_v16 }
 0x2df   :  { %v141_v25 = vpop.f32.mrf.mxu0 }
 0x2e0   :  { %v146_v26 = vrot.slane %v141_v25, 7 }
 0x2e1   :  { %v932_v27 = vpop.f32.mrf.mxu0 }
 0x2e2   :  { %v148_v28 = vadd.f32 %v146_v26, %v1133_v6 }
 0x2e4   :  { %v867_v29 = vmul.f32 -1.442695, %v148_v28 }
 0x2e6   :  { %1016 = vpow2.f32 %v867_v29 }
 0x2f3   :  { %v1017_v30 = vpop.eup %1016 }
 0x2f4   :  { %v152_v31 = vadd.f32 1.0, %v1017_v30 }
 0x2f6   :  { %1018 = vrcp.f32 %v152_v31 }
 0x303   :  { %v1019_v32 = vpop.eup %1018 }
 0x304   :  { %v155_v33 = vmul.f32 2.0, %v1019_v32  ;;  %v162_v38 = vmul.f32 %v1019_v32, %v160_v37 }
 0x306   :  { %v868_v34 = vadd.f32 -1.0, %v155_v33 }
 0x308   :  { %164 = vrot.lane.b32.xlu0 %v868_v34, %s1106_s1 }
 0x37a   :  { %v165_v35 = vpop.permute.xlu0 %164 }
 0x37b   :  { %v167_v36 = vmul.f32 %v1019_v32, %v165_v35 }
 0x37d   :  { %169 = vrot.lane.b32.xlu0 %v167_v36, %s1110_s18 }
 0x3ef   :  { %v170_v39 = vpop.permute.xlu0 %169 }
 0x3f0   :  { %v172_v40 = vadd.f32 %v170_v39, %v162_v38 }
 0x3f2   :  { %1020 = vtanh.f32 %v172_v40  ;;  %v268_v58 = vrot.slane %v172_v40, 7 }
 0x3ff   :  { %v1021_v41 = vpop.eup %1020 }
 0x400   :  { %175 = vrot.lane.b32.xlu1 %v1021_v41, %s1106_s1 }
 0x472   :  { %v176_v42 = vpop.permute.xlu1 %175 }
 0x473   :  { %v178_v43 = vmul.f32 %v1019_v32, %v176_v42 }
 0x475   :  { %v180_v44 = vrot.slane %v178_v43, 1 }
 0x477   :  { %181 = vrot.lane.b32.xlu0 %v180_v44, %s1110_s18 }
 0x4e9   :  { %v182_v45 = vpop.permute.xlu0 %181 }
 0x4ea   :  { %942 = vmatmul.mubr.msk.f32.vlgmr.msra.gmra.mxu1 %vm72_vm1, %v182_v45 }
 0x4eb   :  { %956 = vmatpush3.msra.mxu1 %v1137_v15  ;;  %963 = vmatprep.mubr.msk.f32.mxu1 %vm1108_vm0, %v1107_v16 }
 0x4ec   :  { %957 = vmatprep.subr.mxu1 %v1107_v16 }
 0x4ed   :  { %958 = vmatpush3.msra.mxu1 %v1140_v17 }
 0x4ee   :  { %959 = vmatprep.subr.mxu1 %v1107_v16 }
 0x4ef   :  { %960 = vmatpush3.msra.mxu1 %v1147_v18 }
 0x4f0   :  { %961 = vmatprep.subr.mxu1 %v1107_v16 }
 0x4f1   :  { %962 = vmatpush3.msra.mxu1 %v1162_v20 }
 0x4f2   :  { %977 = vmatprep.subr.mxu1 %v1107_v16 }
 0x5aa   :  { %v251_v46 = vpop.f32.mrf.mxu1 }
 0x5ab   :  { %v256_v47 = vrot.slane %v251_v46, 6 }
 0x5ac   :  { %v943_v48 = vpop.f32.mrf.mxu1 }
 0x5ad   :  { %v258_v49 = vadd.f32 %v256_v47, %v1133_v6 }
 0x5af   :  { %v870_v50 = vmul.f32 -1.442695, %v258_v49 }
 0x5b1   :  { %1022 = vpow2.f32 %v870_v50 }
 0x5be   :  { %v1023_v51 = vpop.eup %1022 }
 0x5bf   :  { %v262_v52 = vadd.f32 1.0, %v1023_v51 }
 0x5c1   :  { %1024 = vrcp.f32 %v262_v52 }
 0x5ce   :  { %v1025_v53 = vpop.eup %1024 }
 0x5cf   :  { %v265_v54 = vmul.f32 2.0, %v1025_v53  ;;  %v270_v59 = vmul.f32 %v1025_v53, %v268_v58 }
 0x5d1   :  { %v871_v55 = vadd.f32 -1.0, %v265_v54 }
 0x5d3   :  { %272 = vrot.lane.b32.xlu1 %v871_v55, %s1106_s1 }
 0x645   :  { %v273_v56 = vpop.permute.xlu1 %272 }
 0x646   :  { %v275_v57 = vmul.f32 %v1025_v53, %v273_v56 }
 0x648   :  { %277 = vrot.lane.b32.xlu0 %v275_v57, %s1110_s18 }
 0x6ba   :  { %v278_v60 = vpop.permute.xlu0 %277 }
 0x6bb   :  { %v280_v61 = vadd.f32 %v278_v60, %v270_v59 }
 0x6bd   :  { %1026 = vtanh.f32 %v280_v61  ;;  %v376_v21 = vrot.slane %v280_v61, 7 }
 0x6ca   :  { %v1027_v62 = vpop.eup %1026 }
 0x6cb   :  { %283 = vrot.lane.b32.xlu1 %v1027_v62, %s1106_s1 }
 0x73d   :  { %v284_v63 = vpop.permute.xlu1 %283 }
 0x73e   :  { %v286_v0 = vmul.f32 %v1025_v53, %v284_v63 }
 0x740   :  { %v288_v1 = vrot.slane %v286_v0, 2 }
 0x742   :  { %289 = vrot.lane.b32.xlu0 %v288_v1, %s1110_s18 }
 0x7b4   :  { %v290_v2 = vpop.permute.xlu0 %289 }
 0x7b5   :  { %953 = vmatmul.mubr.msk.f32.vlgmr.msra.gmra.mxu0 %vm72_vm1, %v290_v2 }
 0x7b6   :  { %967 = vmatpush3.msra.mxu0 %v1137_v15  ;;  %974 = vmatprep.mubr.msk.f32.mxu0 %vm1108_vm0, %v1107_v16 }
 0x7b7   :  { %968 = vmatprep.subr.mxu0 %v1107_v16 }
 0x7b8   :  { %969 = vmatpush3.msra.mxu0 %v1140_v17 }
 0x7b9   :  { %970 = vmatprep.subr.mxu0 %v1107_v16 }
 0x7ba   :  { %971 = vmatpush3.msra.mxu0 %v1147_v18 }
 0x7bb   :  { %972 = vmatprep.subr.mxu0 %v1107_v16 }
 0x7bc   :  { %973 = vmatpush3.msra.mxu0 %v1162_v20 }
 0x7bd   :  { %988 = vmatprep.subr.mxu0 %v1107_v16 }
 0x875   :  { %v359_v3 = vpop.f32.mrf.mxu0 }
 0x876   :  { %v364_v4 = vrot.slane %v359_v3, 5 }
 0x877   :  { %v954_v5 = vpop.f32.mrf.mxu0 }
 0x878   :  { %v366_v7 = vadd.f32 %v364_v4, %v1133_v6 }
 0x87a   :  { %v873_v8 = vmul.f32 -1.442695, %v366_v7 }
 0x87c   :  { %1028 = vpow2.f32 %v873_v8 }
 0x889   :  { %v1029_v9 = vpop.eup %1028 }
 0x88a   :  { %v370_v10 = vadd.f32 1.0, %v1029_v9 }
 0x88c   :  { %1030 = vrcp.f32 %v370_v10 }
 0x899   :  { %v1031_v11 = vpop.eup %1030 }
 0x89a   :  { %v373_v12 = vmul.f32 2.0, %v1031_v11  ;;  %v378_v22 = vmul.f32 %v1031_v11, %v376_v21 }
 0x89c   :  { %v874_v13 = vadd.f32 -1.0, %v373_v12 }
 0x89e   :  { %380 = vrot.lane.b32.xlu1 %v874_v13, %s1106_s1 }
 0x910   :  { %v381_v14 = vpop.permute.xlu1 %380 }
 0x911   :  { %v383_v19 = vmul.f32 %v1031_v11, %v381_v14 }
 0x913   :  { %385 = vrot.lane.b32.xlu0 %v383_v19, %s1110_s18 }
 0x985   :  { %v386_v23 = vpop.permute.xlu0 %385 }
 0x986   :  { %v388_v24 = vadd.f32 %v386_v23, %v378_v22 }
 0x988   :  { %1032 = vtanh.f32 %v388_v24  ;;  %v484_v42 = vrot.slane %v388_v24, 7 }
 0x995   :  { %v1033_v25 = vpop.eup %1032 }
 0x996   :  { %391 = vrot.lane.b32.xlu1 %v1033_v25, %s1106_s1 }
 0xa08   :  { %v392_v26 = vpop.permute.xlu1 %391 }
 0xa09   :  { %v394_v27 = vmul.f32 %v1031_v11, %v392_v26 }
 0xa0b   :  { %v396_v28 = vrot.slane %v394_v27, 3 }
 0xa0d   :  { %397 = vrot.lane.b32.xlu0 %v396_v28, %s1110_s18 }
 0xa7f   :  { %v398_v29 = vpop.permute.xlu0 %397 }
 0xa80   :  { %964 = vmatmul.mubr.msk.f32.vlgmr.msra.gmra.mxu1 %vm72_vm1, %v398_v29 }
 0xa81   :  { %978 = vmatpush3.msra.mxu1 %v1137_v15  ;;  %985 = vmatprep.mubr.msk.f32.mxu1 %vm1108_vm0, %v1107_v16 }
 0xa82   :  { %979 = vmatprep.subr.mxu1 %v1107_v16 }
 0xa83   :  { %980 = vmatpush3.msra.mxu1 %v1140_v17 }
 0xa84   :  { %981 = vmatprep.subr.mxu1 %v1107_v16 }
 0xa85   :  { %982 = vmatpush3.msra.mxu1 %v1147_v18 }
 0xa86   :  { %983 = vmatprep.subr.mxu1 %v1107_v16 }
 0xa87   :  { %984 = vmatpush3.msra.mxu1 %v1162_v20 }
 0xb40   :  { %v467_v30 = vpop.f32.mrf.mxu1 }
 0xb41   :  { %v472_v31 = vrot.slane %v467_v30, 4 }
 0xb42   :  { %v965_v32 = vpop.f32.mrf.mxu1 }
 0xb43   :  { %v474_v33 = vadd.f32 %v472_v31, %v1133_v6 }
 0xb45   :  { %v876_v34 = vmul.f32 -1.442695, %v474_v33 }
 0xb47   :  { %1034 = vpow2.f32 %v876_v34 }
 0xb54   :  { %v1035_v35 = vpop.eup %1034 }
 0xb55   :  { %v478_v36 = vadd.f32 1.0, %v1035_v35 }
 0xb57   :  { %1036 = vrcp.f32 %v478_v36 }
 0xb64   :  { %v1037_v37 = vpop.eup %1036 }
 0xb65   :  { %v481_v38 = vmul.f32 2.0, %v1037_v37  ;;  %v486_v43 = vmul.f32 %v1037_v37, %v484_v42  ;;  %v32_v42 = vld [vmem:[#allocation2 + $0x22] sm:$0x1] }
 0xb67   :  { %v877_v39 = vadd.f32 -1.0, %v481_v38 }
 0xb69   :  { %488 = vrot.lane.b32.xlu1 %v877_v39, %s1106_s1 }
 0xbdb   :  { %v489_v40 = vpop.permute.xlu1 %488 }
 0xbdc   :  { %v491_v41 = vmul.f32 %v1037_v37, %v489_v40 }
 0xbde   :  { %493 = vrot.lane.b32.xlu0 %v491_v41, %s1110_s18 }
 0xc50   :  { %v494_v44 = vpop.permute.xlu0 %493 }
 0xc51   :  { %v496_v45 = vadd.f32 %v494_v44, %v486_v43  ;;  %v828_v43 = vrot.slane %v32_v42, 1 }
 0xc53   :  { %1038 = vtanh.f32 %v496_v45 }
 0xc60   :  { %v1039_v46 = vpop.eup %1038 }
 0xc61   :  { %499 = vrot.lane.b32.xlu1 %v1039_v46, %s1106_s1 }
 0xcd3   :  { %v500_v47 = vpop.permute.xlu1 %499 }
 0xcd4   :  { %v502_v48 = vmul.f32 %v1037_v37, %v500_v47 }
 0xcd6   :  { %v504_v49 = vrot.slane %v502_v48, 4 }
 0xcd8   :  { %505 = vrot.lane.b32.xlu0 %v504_v49, %s1110_s18 }
 0xd4a   :  { %v506_v50 = vpop.permute.xlu0 %505 }
 0xd4b   :  { %975 = vmatmul.mubr.msk.f32.vlgmr.msra.gmra.mxu0 %vm72_vm1, %v506_v50 }
 0xd4c   :  { %989 = vmatpush3.msra.mxu0 %v1137_v15  ;;  %996 = vmatprep.mubr.msk.f32.mxu0 %vm1108_vm0, %v1107_v16 }
 0xd4d   :  { %990 = vmatprep.subr.mxu0 %v1107_v16 }
 0xd4e   :  { %991 = vmatpush3.msra.mxu0 %v1140_v17 }
 0xd4f   :  { %992 = vmatprep.subr.mxu0 %v1107_v16 }
 0xd50   :  { %993 = vmatpush3.msra.mxu0 %v1147_v18 }
 0xd51   :  { %994 = vmatprep.subr.mxu0 %v1107_v16  ;;  %v592_v16 = vrot.slane %v496_v45, 7 }
 0xd52   :  { %995 = vmatpush3.msra.mxu0 %v1162_v20 }
 0xe0b   :  { %v575_v51 = vpop.f32.mrf.mxu0 }
 0xe0c   :  { %v580_v52 = vrot.slane %v575_v51, 3 }
 0xe0d   :  { %v976_v53 = vpop.f32.mrf.mxu0 }
 0xe0e   :  { %v582_v15 = vadd.f32 %v580_v52, %v1133_v6 }
 0xe10   :  { %v879_v54 = vmul.f32 -1.442695, %v582_v15  ;;  %v33_v15 = vld [vmem:[#allocation2 + $0x23] sm:$0x1] }
 0xe12   :  { %1040 = vpow2.f32 %v879_v54  ;;  %v842_v54 = vrot.slane %v33_v15, 1 }
 0xe1f   :  { %v1041_v55 = vpop.eup %1040 }
 0xe20   :  { %v586_v56 = vadd.f32 1.0, %v1041_v55 }
 0xe22   :  { %1042 = vrcp.f32 %v586_v56 }
 0xe2f   :  { %v1043_v57 = vpop.eup %1042 }
 0xe30   :  { %v589_v17 = vmul.f32 2.0, %v1043_v57  ;;  %v594_v20 = vmul.f32 %v1043_v57, %v592_v16 }
 0xe32   :  { %v880_v58 = vadd.f32 -1.0, %v589_v17 }
 0xe34   :  { %596 = vrot.lane.b32.xlu1 %v880_v58, %s1106_s1 }
 0xea6   :  { %v597_v18 = vpop.permute.xlu1 %596 }
 0xea7   :  { %v599_v59 = vmul.f32 %v1043_v57, %v597_v18 }
 0xea9   :  { %601 = vrot.lane.b32.xlu0 %v599_v59, %s1110_s18 }
 0xf1b   :  { %v602_v60 = vpop.permute.xlu0 %601 }
 0xf1c   :  { %v604_v61 = vadd.f32 %v602_v60, %v594_v20 }
 0xf1e   :  { %1044 = vtanh.f32 %v604_v61  ;;  %v700_v21 = vrot.slane %v604_v61, 7 }
 0xf2b   :  { %v1045_v62 = vpop.eup %1044 }
 0xf2c   :  { %607 = vrot.lane.b32.xlu1 %v1045_v62, %s1106_s1 }
 0xf9e   :  { %v608_v63 = vpop.permute.xlu1 %607 }
 0xf9f   :  { %v610_v0 = vmul.f32 %v1043_v57, %v608_v63 }
 0xfa1   :  { %v612_v1 = vrot.slane %v610_v0, 5 }
 0xfa3   :  { %613 = vrot.lane.b32.xlu0 %v612_v1, %s1110_s18 }
0x1015   :  { %v614_v2 = vpop.permute.xlu0 %613 }
0x1016   :  { %986 = vmatmul.mubr.msk.f32.vlgmr.msra.gmra.mxu1 %vm72_vm1, %v614_v2 }
0x10d6   :  { %v683_v3 = vpop.f32.mrf.mxu1 }
0x10d7   :  { %v688_v4 = vrot.slane %v683_v3, 2 }
0x10d8   :  { %v987_v5 = vpop.f32.mrf.mxu1 }
0x10d9   :  { %v690_v7 = vadd.f32 %v688_v4, %v1133_v6 }
0x10db   :  { %v882_v8 = vmul.f32 -1.442695, %v690_v7 }
0x10dd   :  { %1046 = vpow2.f32 %v882_v8 }
0x10ea   :  { %v1047_v9 = vpop.eup %1046 }
0x10eb   :  { %v694_v10 = vadd.f32 1.0, %v1047_v9 }
0x10ed   :  { %1048 = vrcp.f32 %v694_v10 }
0x10fa   :  { %v1049_v11 = vpop.eup %1048 }
0x10fb   :  { %v697_v12 = vmul.f32 2.0, %v1049_v11  ;;  %v702_v22 = vmul.f32 %v1049_v11, %v700_v21 }
0x10fd   :  { %v883_v13 = vadd.f32 -1.0, %v697_v12 }
0x10ff   :  { %704 = vrot.lane.b32.xlu1 %v883_v13, %s1106_s1 }
0x1171   :  { %v705_v14 = vpop.permute.xlu1 %704 }
0x1172   :  { %v707_v19 = vmul.f32 %v1049_v11, %v705_v14 }
0x1174   :  { %709 = vrot.lane.b32.xlu0 %v707_v19, %s1110_s18 }
0x11e6   :  { %v710_v23 = vpop.permute.xlu0 %709 }
0x11e7   :  { %v712_v24 = vadd.f32 %v710_v23, %v702_v22 }
0x11e9   :  { %1050 = vtanh.f32 %v712_v24  ;;  %v808_v44 = vrot.slane %v712_v24, 7 }
0x11f6   :  { %v1051_v25 = vpop.eup %1050 }
0x11f7   :  { %715 = vrot.lane.b32.xlu1 %v1051_v25, %s1106_s1 }
0x1269   :  { %v716_v26 = vpop.permute.xlu1 %715 }
0x126a   :  { %v718_v27 = vmul.f32 %v1049_v11, %v716_v26 }
0x126c   :  { %v720_v28 = vrot.slane %v718_v27, 6 }
0x126e   :  { %721 = vrot.lane.b32.xlu0 %v720_v28, %s1110_s18 }
0x12e0   :  { %v722_v29 = vpop.permute.xlu0 %721 }
0x12e1   :  { %997 = vmatmul.mubr.msk.f32.vlgmr.msra.gmra.mxu0 %vm72_vm1, %v722_v29 }
0x13a1   :  { %v791_v30 = vpop.f32.mrf.mxu0 }
0x13a2   :  { %v796_v31 = vrot.slane %v791_v30, 1 }
0x13a3   :  { %v998_v32 = vpop.f32.mrf.mxu0 }
0x13a4   :  { %v798_v33 = vadd.f32 %v796_v31, %v1133_v6 }
0x13a6   :  { %v885_v34 = vmul.f32 -1.442695, %v798_v33 }
0x13a8   :  { %1052 = vpow2.f32 %v885_v34 }
0x13b5   :  { %v1053_v35 = vpop.eup %1052 }
0x13b6   :  { %v802_v36 = vadd.f32 1.0, %v1053_v35 }
0x13b8   :  { %1054 = vrcp.f32 %v802_v36 }
0x13c5   :  { %v1055_v37 = vpop.eup %1054 }
0x13c6   :  { %v805_v38 = vmul.f32 2.0, %v1055_v37  ;;  %v810_v6 = vmul.f32 %v1055_v37, %v808_v44 }
0x13c8   :  { %v886_v39 = vadd.f32 -1.0, %v805_v38 }
0x13ca   :  { %812 = vrot.lane.b32.xlu1 %v886_v39, %s1106_s1 }
0x143c   :  { %v813_v40 = vpop.permute.xlu1 %812 }
0x143d   :  { %v815_v41 = vmul.f32 %v1055_v37, %v813_v40 }
0x143f   :  { %817 = vrot.lane.b32.xlu0 %v815_v41, %s1110_s18 }
0x1443   :  { %829 = vrot.lane.b32.xlu0 %v828_v43, %s1109_s0 }
0x14b1   :  { %v818_v45 = vpop.permute.xlu0 %817 }
0x14b2   :  { %v820_v46 = vadd.f32 %v818_v45, %v810_v6 }
0x14b4   :  { %1056 = vtanh.f32 %v820_v46 }
0x14b5   :  { %v830_v49 = vpop.permute.xlu0 %829 }
0x14c1   :  { %v1057_v47 = vpop.eup %1056 }
0x14c2   :  { %823 = vrot.lane.b32.xlu1 %v1057_v47, %s1106_s1 }
0x1534   :  { %v824_v48 = vpop.permute.xlu1 %823 }
0x1535   :  { %v826_v50 = vmul.f32 %v1055_v37, %v824_v48 }
0x1537   :  { %v832_v51 = vmul.f32 %v830_v49, %v826_v50 }
0x1539   :  { %834 = vrot.lane.b32.xlu1 %v832_v51, %s1110_s18 }
0x15ab   :  { %v835_v52 = vpop.permute.xlu1 %834 }
0x15ac   :  { %v838_v53 = vsel %vm837_vm2, %v835_v52, 0.0 }
0x15ad   :  { %839 = vadd.xlane.f32.xlu0 %v838_v53 }
0x1636   :  { %v840_v55 = vpop.xlane.xlu0 %839 }
0x1637   :  { %v844_v56 = vadd.f32 %v842_v54, %v840_v55 }
0x1639   :  { %846 = vst.msk [vmem:[#allocation5 - $0x7] sm:$0x80] %vm845_vm3, %v844_v56 }
0x163a   :  { %1089 = shalt.err (!%p1086_p9)
}
0x163b   :  { %856 = dma.vmem_to_hbm [thread:$0]  %s854_s20, 16, %s1266_s2, [#allocation4]  }
0x163c   :  { %1100 = dma.done.wait [#allocation4], 16  }
0x163d   :  { %1101 = vsyncadd [#allocation4], 4294967280 }
0x163e   :  { %860 = vsyncpa [#allocation3], 1 }
0x163f   :  { %861 = vsyncpa [#allocation4], 1 }

</bundles_post_ra>
